<compile_context>
chip_gen: v6e
topology: v6e:2x2x1
jax: 0.10.0
libtpu: 0.0.40
codegen_flags: <defaults>
</compile_context>

<pallas_src>
import jax
import jax.numpy as jnp
from jax import lax
from jax.experimental import pallas as pl
from jax.experimental.pallas import tpu as pltpu


def _logistic_regression_kernel(x_ref, w_ref, b_ref, o_ref):
    # x_ref: (B_TILE, F) VMEM; w_ref: (1, F) VMEM; b_ref: (1, 1) SMEM;
    # o_ref: (1, B_TILE) VMEM (lane-dense output).
    z = lax.dot_general(
        w_ref[...], x_ref[...],
        dimension_numbers=(((1,), (1,)), ((), ())),   # contract over F
        preferred_element_type=jnp.float32)           # (1, B_TILE), f32 accumulate
    z = z + b_ref[0, 0]
    o_ref[...] = jax.nn.sigmoid(z).astype(o_ref.dtype)


def _round_up(n, m):
    return ((n + m - 1) // m) * m


def _vmem_capacity_bytes():
    try:
        return int(pltpu.get_tpu_info().vmem_capacity_bytes)
    except Exception:
        return 64 * 1024 * 1024   # conservative (v7x-sized) fallback


def _choose_b_tile(B, F, itemsize):
    """Pick the batch tile (rows) by bytes, per TPU generation."""
    vmem_cap = _vmem_capacity_bytes()
    # Double-buffered x budget: ~32 MiB on 128 MiB-VMEM chips (v5e/v6e),
    # ~16 MiB on 64 MiB-VMEM chips (v7x)  ->  x tile of ~16 / ~8 MiB.
    xbuf_budget = 32 * 2**20 if vmem_cap >= 96 * 2**20 else 16 * 2**20
    rows = xbuf_budget // (2 * F * itemsize)
    b_tile = min((rows // 128) * 128, 8192)
    if b_tile < 128:
        raise ValueError(
            f"n_input_features={F} too wide for a 128-row double-buffered tile "
            f"within the {xbuf_budget >> 20} MiB VMEM budget; add F-tiling.")
    # Give both TensorCores (v7x) work once x exceeds a few MiB: force >= 2 tiles.
    if B * F * itemsize > 4 * 2**20:
        b_tile = min(b_tile, _round_up(pl.cdiv(B, 2), 128))
    return max(b_tile, 128)


def logistic_model(x, weight, bias, b_tile=None):
    """x: (B, F); weight: (1, F) (PyTorch layout); bias: (1,). Returns (B, 1)."""
    B, F = x.shape
    itemsize = jnp.dtype(x.dtype).itemsize

    if b_tile is None:
        b_tile = _choose_b_tile(B, F, itemsize)

    b_smem = bias.reshape(1, 1).astype(jnp.float32)

    if B <= b_tile:
        # Single-tile path: pad only the batch remainder to a sublane multiple
        # (at most 7 rows -- negligible, unlike a full-x copy).
        b_eff = _round_up(B, 8)
        x_in = x if b_eff == B else jnp.pad(x, ((0, b_eff - B), (0, 0)))
        grid = (1,)
        x_spec = pl.BlockSpec((b_eff, F), lambda i: (0, 0))
        out_spec = pl.BlockSpec((1, b_eff), lambda i: (0, 0))
        out_cols = b_eff
    else:
        assert b_tile % 128 == 0, "multi-tile B_TILE must be a multiple of 128"
        b_eff = b_tile
        x_in = x                                   # no padded copy of x in HBM
        grid = (pl.cdiv(B, b_tile),)               # tail block may be partial
        x_spec = pl.BlockSpec((b_tile, F), lambda i: (i, 0))
        out_spec = pl.BlockSpec((1, b_tile), lambda i: (0, i))   # lane-dense out
        out_cols = B

    # Double-buffered x tile + resident weight + double-buffered output tile.
    vmem_need = 2 * b_eff * F * itemsize + 2 * F * itemsize + 2 * b_eff * 4
    vmem_cap = _vmem_capacity_bytes()
    vmem_limit = int(min(max(2 * vmem_need, 16 * 2**20), (3 * vmem_cap) // 4))

    out = pl.pallas_call(
        _logistic_regression_kernel,
        out_shape=jax.ShapeDtypeStruct((1, out_cols), jnp.float32),
        grid_spec=pl.GridSpec(
            grid=grid,
            in_specs=[
                x_spec,                                             # x tile
                pl.BlockSpec((1, F), lambda i: (0, 0)),             # weight (resident)
                pl.BlockSpec(memory_space=pltpu.MemorySpace.SMEM),  # bias scalar
            ],
            out_specs=out_spec,
        ),
        compiler_params=pltpu.CompilerParams(
            dimension_semantics=("parallel",),
            vmem_limit_bytes=vmem_limit),
        cost_estimate=pl.CostEstimate(
            flops=2 * B * F,
            transcendentals=B,
            bytes_accessed=(B * F + F) * itemsize + B * 4),
    )(x_in, weight, b_smem)

    return out[0, :B].reshape(B, 1)


if __name__ == "__main__":
    # Small shapes consistent with nn.Linear(n_input_features, 1)
    batch, n_features = 8, 32

    key = jax.random.PRNGKey(0)
    kx, kw, kb = jax.random.split(key, 3)

    x = jax.random.normal(kx, (batch, n_features), dtype=jnp.float32)
    # Parameter init mimicking nn.Linear's uniform(-1/sqrt(F), 1/sqrt(F))
    bound = 1.0 / jnp.sqrt(jnp.float32(n_features))
    weight = jax.random.uniform(kw, (1, n_features), jnp.float32, -bound, bound)
    bias = jax.random.uniform(kb, (1,), jnp.float32, -bound, bound)

    # Primary check: small batch (single-tile path).
    y = logistic_model(x, weight, bias)
    jax.block_until_ready(y)
    y_ref = jax.nn.sigmoid(x @ weight.T + bias)
    assert y.shape == (batch, 1)
    assert jnp.allclose(y, y_ref, atol=1e-5), "mismatch vs reference (single tile)"

    # Secondary check: multi-tile, non-divisible batch -> exercises the
    # padding-free tail-block path (grid=(3,), last block partial).
    big_batch = 300
    x2 = jax.random.normal(jax.random.PRNGKey(1), (big_batch, n_features), jnp.float32)
    y2 = logistic_model(x2, weight, bias, b_tile=128)
    jax.block_until_ready(y2)
    y2_ref = jax.nn.sigmoid(x2 @ weight.T + bias)
    assert y2.shape == (big_batch, 1)
    assert jnp.allclose(y2, y2_ref, atol=1e-5), "mismatch vs reference (multi tile)"

    print("KERNEL_OK")
</pallas_src>

<mosaic_0001>
module attributes {stable_mosaic.version = 11 : i64} {
  func.func @_logistic_regression_kernel(%arg0: i32, %arg1: memref<8x32xf32, #tpu.memory_space<vmem>>, %arg2: memref<1x32xf32, #tpu.memory_space<vmem>>, %arg3: memref<1x1xf32, #tpu.memory_space<smem>>, %arg4: memref<1x8xf32, #tpu.memory_space<vmem>>) attributes {dimension_semantics = [#tpu.dimension_semantics<parallel>], iteration_bounds = array<i64: 1>, scalar_prefetch = 0 : i64, scratch_operands = 0 : i64, tpu.core_type = #tpu.core_type<tc>, window_params = [{pipeline_mode = #tpu.pipeline_mode<synchronous>, transform_indices = @transform_0, window_bounds = array<i64: 8, 32>}, {pipeline_mode = #tpu.pipeline_mode<synchronous>, transform_indices = @transform_1, window_bounds = array<i64: 1, 32>}, {transform_indices = @transform_2, window_bounds = array<i64: 1, 1>}, {pipeline_mode = #tpu.pipeline_mode<synchronous>, transform_indices = @transform_3, window_bounds = array<i64: 1, 8>}]} {
    %c0 = arith.constant 0 : index
    %c0_0 = arith.constant 0 : index
    %0 = vector.load %arg2[%c0, %c0_0] : memref<1x32xf32, #tpu.memory_space<vmem>>, vector<1x32xf32>
    %c0_1 = arith.constant 0 : index
    %c0_2 = arith.constant 0 : index
    %1 = vector.load %arg1[%c0_1, %c0_2] : memref<8x32xf32, #tpu.memory_space<vmem>>, vector<8x32xf32>
    %cst = arith.constant dense<0.000000e+00> : vector<1x8xf32>
    %2 = tpu.matmul %0, %1, %cst {dimension_numbers = #tpu.dot_dimension_numbers<[1], [1], [0], [0], [0, 0, 1, 0], [], []>} : vector<1x32xf32>, vector<8x32xf32>, vector<1x8xf32> -> vector<1x8xf32>
    %c0_3 = arith.constant 0 : index
    %c0_4 = arith.constant 0 : index
    %3 = memref.load %arg3[%c0_3, %c0_4] : memref<1x1xf32, #tpu.memory_space<smem>>
    %4 = vector.broadcast %3 : f32 to vector<1x8xf32>
    %5 = arith.addf %2, %4 : vector<1x8xf32>
    %6 = arith.negf %5 : vector<1x8xf32>
    %7 = math.exp %6 : vector<1x8xf32>
    %cst_5 = arith.constant 1.000000e+00 : f32
    %8 = vector.broadcast %cst_5 : f32 to vector<1x8xf32>
    %9 = arith.addf %8, %7 : vector<1x8xf32>
    %10 = arith.divf %8, %9 : vector<1x8xf32>
    %c0_6 = arith.constant 0 : index
    %c0_7 = arith.constant 0 : index
    %11 = vector.load %arg4[%c0_6, %c0_7] : memref<1x8xf32, #tpu.memory_space<vmem>>, vector<1x8xf32>
    tpu.vector_store %arg4[%c0_6, %c0_7], %10 {strides = array<i32>} : memref<1x8xf32, #tpu.memory_space<vmem>>, vector<1x8xf32>,
    return
  }
  func.func @transform_0(%arg0: i32) -> (i32, i32) {
    %c0_i32 = arith.constant 0 : i32
    %c0_i32_0 = arith.constant 0 : i32
    %c0_i32_1 = arith.constant 0 : i32
    return %c0_i32, %c0_i32_0 : i32, i32
  }
  func.func @transform_1(%arg0: i32) -> (i32, i32) {
    %c0_i32 = arith.constant 0 : i32
    %c0_i32_0 = arith.constant 0 : i32
    %c0_i32_1 = arith.constant 0 : i32
    return %c0_i32, %c0_i32_0 : i32, i32
  }
  func.func @transform_2(%arg0: i32) -> (i32, i32) {
    %c0_i32 = arith.constant 0 : i32
    %c0_i32_0 = arith.constant 0 : i32
    %c0_i32_1 = arith.constant 0 : i32
    return %c0_i32, %c0_i32_0 : i32, i32
  }
  func.func @transform_3(%arg0: i32) -> (i32, i32) {
    %c0_i32 = arith.constant 0 : i32
    %c0_i32_0 = arith.constant 0 : i32
    %c0_i32_1 = arith.constant 0 : i32
    return %c0_i32, %c0_i32_0 : i32, i32
  }
}

</mosaic_0001>

<bundles_post_ra>
// kernel: tpu_custom_call.1
= control target key start
LH: loop header
LB: loop body
LE: loop exit
PB: predicated region body
PF: predicated region fallthrough
CT: control target
= control target key end

     0   :  { %9 = vsyncpa [#allocation4], 0  ;;  %s230_s0 = inlined_call_operand.hbm [shape: f32[8,32], index: 0, kind: input, shape index: {}]   ;;  %s231_s1 = inlined_call_operand.vmem [shape: f32[1,32], index: 1, kind: input, shape index: {}]   ;;  %s232_s2 = inlined_call_operand.<no memory space> [shape: f32[1,1], index: 2, kind: input, shape index: {}]   ;;  %s233_s3 = inlined_call_operand.hbm [shape: f32[1,8], index: 3, kind: output, shape index: {}]  }
   0x1   :  { %10 = vsyncpa [#allocation5], 0  ;;  %s194_s12 = smov [#allocation3]  }
   0x2   :  { %s17_s13 = sshll.u32 %s194_s12, 4  ;;  %s18_s13 = int_to_ptr.vmem [resolvable:$true] %s17_s13 }
   0x3   :  { %s158_s14 = scalar_lea.vmem %s18_s13, 128  ;;  %p163_p1 = scmp.lt.s32.totalorder %s18_s13, %s18_s13 }
   0x4   :  { %p159_p0 = scmp.ne.s32.totalorder %s18_s13, %s158_s14  ;;  %p164_p2 = scmp.lt.s32.totalorder %s158_s14, %s158_s14 }
   0x6   :  { %p165_p3 = por %p164_p2, %p163_p1 }
   0x8   :  { %p166_p4 = pnand %p165_p3, %p159_p0 }
   0xa   :  { %169 = shalt.err (!%p166_p4)
}
   0xb   :  { %20 = dma.hbm_to_vmem [thread:$0]  %s230_s0, 128, %s18_s13, [#allocation4]  }
   0xc   :  { %190 = dma.done.wait [#allocation4], 128  }
   0xd   :  { %191 = vsyncadd [#allocation4], 4294967168  ;;  %v195_v0 = vmov 0.0   ;;  %vm196_vm0 = vmmov 0   ;;  %vm32_vm1 = vcmask 261120   ;;  %v29_v1 = vld [vmem:[#allocation3] sm:$0xff]  ;;  %v31_v3 = vstv %s232_s2 }
   0xe   :  { %137 = vmatprep.subr.mxu0 %v195_v0  ;;  %139 = vmatprep.mubr.msk.f32.mxu0 %vm196_vm0, %v195_v0  ;;  %v28_v2 = vld [vmem:[%s231_s1] sm:$0x1]  ;;  %s197_s0 = smov [#allocation6]   ;;  %vm115_vm2 = vcmask 57344  }
   0xf   :  { %138 = vmatpush3.xpose.msk.msra.mxu0 %vm32_vm1, %v29_v1  ;;  %s123_s21 = sshll.u32 %s197_s0, 4  ;;  %s124_s21 = int_to_ptr.vmem [resolvable:$true] %s123_s21 }
  0x10   :  { %s170_s1 = scalar_lea.vmem %s124_s21, 16  ;;  %s174_s22 = scalar_lea.vmem %s124_s21, 32 }
  0x11   :  { %p171_p5 = scmp.ne.s32.totalorder %s124_s21, %s170_s1  ;;  %p175_p6 = scmp.lt.s32.totalorder %s124_s21, %s124_s21 }
  0x12   :  { %140 = vmatmul.mubr.msk.f32.vlgmr.msra.gmra.mxu0 %vm32_vm1, %v28_v2  ;;  %p176_p7 = scmp.lt.s32.totalorder %s174_s22, %s170_s1 }
  0x14   :  { %p177_p8 = por %p176_p7, %p175_p6 }
  0x16   :  { %p178_p9 = pnand %p177_p8, %p171_p5 }
  0xd2   :  { %v105_v4 = vpop.f32.mrf.mxu0 }
  0xd3   :  { %v106_v5 = vadd.f32 %v105_v4, %v31_v3 }
  0xd4   :  { %v141_v6 = vpop.f32.mrf.mxu0 }
  0xd5   :  { %v134_v7 = vmul.f32 -1.442695, %v106_v5 }
  0xd7   :  { %146 = vpow2.f32 %v134_v7 }
  0xe4   :  { %v147_v8 = vpop.eup %146 }
  0xe5   :  { %v112_v9 = vadd.f32 1.0, %v147_v8 }
  0xe7   :  { %148 = vrcp.f32 %v112_v9 }
  0xf4   :  { %v149_v10 = vpop.eup %148 }
  0xf5   :  { %116 = vst.msk [vmem:[#allocation6] sm:$0x1] %vm115_vm2, %v149_v10 }
  0xf6   :  { %181 = shalt.err (!%p178_p9)
}
  0xf7   :  { %126 = dma.vmem_to_hbm [thread:$0]  %s124_s21, 16, %s233_s3, [#allocation5]  }
  0xf8   :  { %192 = dma.done.wait [#allocation5], 16  }
  0xf9   :  { %193 = vsyncadd [#allocation5], 4294967280 }
  0xfa   :  { %130 = vsyncpa [#allocation4], 1 }
  0xfb   :  { %131 = vsyncpa [#allocation5], 1 }

</bundles_post_ra>
